<compile_context>
chip_gen: v7x
topology: tpu7x:2x2x1
jax: 0.10.0
libtpu: 0.0.40
codegen_flags: <defaults>
</compile_context>

<pallas_src>
import jax
import jax.numpy as jnp
from jax import lax
from jax.experimental import pallas as pl
from jax.experimental.pallas import tpu as pltpu


# ------------------------------------------------------------------ weights ---

def _interp_matrix(n_in: int, n_out: int) -> jnp.ndarray:
    """1-D bilinear resize weights, align_corners=True (nn.UpsamplingBilinear2d).

    Returns float32 (n_out, n_in)."""
    if n_out == 1:
        src = jnp.zeros((1,), dtype=jnp.float32)
    else:
        src = jnp.arange(n_out, dtype=jnp.float32) * (n_in - 1) / (n_out - 1)
    i0 = jnp.clip(jnp.floor(src).astype(jnp.int32), 0, n_in - 1)
    i1 = jnp.clip(i0 + 1, 0, n_in - 1)
    frac = src - i0.astype(jnp.float32)
    w = (jax.nn.one_hot(i0, n_in, dtype=jnp.float32) * (1.0 - frac)[:, None]
         + jax.nn.one_hot(i1, n_in, dtype=jnp.float32) * frac[:, None])
    return w


# ------------------------------------------------------------------ kernels ---

def _dense_kernel(wfull_ref, x1_ref, x2_ref, o_ref):
    """Lane-dense small-map path (spatially flattened layout).

    wfull_ref: (H*W, L_out)  composed kron(Wh, Ww)^T, resident
    x1_ref   : (nb, C1, H*W)
    x2_ref   : (nb, C2, L_out)
    o_ref    : (nb, C1+C2, L_out)
    """
    nb, c1, _ = x1_ref.shape
    w_full = wfull_ref[...]                                     # hoisted, resident

    # x2 pass-through for the whole image block (full 128-lane rows).
    o_ref[:, c1:, :] = x2_ref[...].astype(o_ref.dtype)

    def per_image(im, carry):
        # (C1, H*W) @ (H*W, L_out) -> (C1, L_out), f32 accumulation on the MXU.
        up = jnp.dot(x1_ref[im], w_full, preferred_element_type=jnp.float32)
        o_ref[pl.ds(im, 1), :c1, :] = up[None].astype(o_ref.dtype)
        return carry

    lax.fori_loop(0, nb, per_image, 0)


def _separable_kernel(wh_ref, wwt_ref, x1_ref, x2_hbm, o_ref, copy_sem):
    """Separable large-map path (W_out >= 128, NCHW layout, x2 via DMA).

    wh_ref : (H_out, H)   compute dtype, resident
    wwt_ref: (W, W_out)   compute dtype, resident (pre-transposed in wrapper)
    x1_ref : (nb, C1, H, W)
    x2_hbm : (N, C2, H_out, W_out)   raw HBM ref (memory_space=pl.ANY)
    o_ref  : (nb, C1+C2, H_out, W_out)
    """
    nb, c1, h, w = x1_ref.shape
    c_tot = o_ref.shape[1]
    c2 = c_tot - c1
    h_out = wh_ref.shape[0]
    w_out = wwt_ref.shape[1]
    p = nb * c1
    i = pl.program_id(0)

    # x2 pass-through rides the DMA engine, overlapped with the matmuls below;
    # it never touches the VPU/vst slots and needs no double-buffered VMEM block.
    cp = pltpu.make_async_copy(
        x2_hbm.at[pl.ds(i * nb, nb)],           # (nb, C2, H_out, W_out) HBM slice
        o_ref.at[:, pl.ds(c1, c2), :, :],       # channels [C1:] of the output block
        copy_sem)
    cp.start()

    # Separable bilinear upsample: W-pass as one big MXU matmul ...
    # (reshape is layout-preserving when H % 8 == 0; otherwise Mosaic relays out.)
    x = x1_ref[...].reshape(p * h, w)
    a = jnp.dot(x, wwt_ref[...], preferred_element_type=jnp.float32)   # (P*H, W_out)
    a = a.astype(wh_ref.dtype).reshape(p, h, w_out)
    # ... then the H-pass as a batched matmul over the planes.  Mosaic's dot
    # lowering needs matching batch dims, so Wh is broadcast once per grid step
    # (tiny, compute dtype — half-size for bf16 pipelines).
    wh_b = jnp.broadcast_to(wh_ref[...], (p, h_out, h))
    up = jnp.einsum('poh,phj->poj', wh_b, a,
                    preferred_element_type=jnp.float32)                # (P, H_out, W_out)
    o_ref[:, :c1, :, :] = up.reshape(nb, c1, h_out, w_out).astype(o_ref.dtype)

    cp.wait()


# ----------------------------------------------------------------- sizing -----

_MIN_BLOCK_BYTES = 1 << 20       # keep per-step blocks >= ~1 MiB
_TARGET_GRID_STEPS = 8           # >= 4 steps per TensorCore on v7x megacore
_DENSE_WEIGHT_LIMIT = 4 << 20    # composed kron weight must stay VMEM-resident


def _vmem_capacity_bytes() -> int:
    try:
        cap = getattr(pltpu.get_tpu_info(), "vmem_capacity_bytes", None)
        if cap:
            return int(cap)
    except Exception:
        pass
    return 64 * 1024 * 1024      # conservative fallback (v7x per-TC size)


def _choose_nb(n, per_image_block_bytes, per_image_temp_bytes, weight_bytes,
               block_budget_bytes):
    """Images per grid step: fit the generation's VMEM budget (blocks are
    double-buffered, plus the in-kernel f32 temporaries), but prefer >=
    _TARGET_GRID_STEPS grid steps as long as each block stays >= ~1 MiB."""
    per_image = max(2 * per_image_block_bytes + per_image_temp_bytes, 1)
    avail = max(block_budget_bytes - 2 * weight_bytes, per_image)
    nb_budget = max(1, avail // per_image)
    nb_floor = max(1, -(-_MIN_BLOCK_BYTES // per_image))          # ceil(1MiB / per_image)
    nb_depth = max(nb_floor, -(-n // _TARGET_GRID_STEPS))         # >= 8 grid steps
    nb = int(min(n, nb_budget, nb_depth))
    nb = max(nb, 1)
    while n % nb:                                                 # no ragged tail
        nb -= 1
    return nb


# ----------------------------------------------------------------- wrapper ----

def decoder_forward(x1: jnp.ndarray, x2: jnp.ndarray, scale_factor: int) -> jnp.ndarray:
    """Pallas equivalent of Decoder.forward: bilinearly upsample x1
    (align_corners=True), concat with x2 along channels — fused in one kernel."""
    n, c1, h, w = x1.shape
    n2, c2, h2, w2 = x2.shape
    h_out, w_out = int(h * scale_factor), int(w * scale_factor)
    assert n2 == n and (h2, w2) == (h_out, w_out), \
        "x2 must match the upsampled x1 spatially"
    c_tot = c1 + c2

    out_dtype = jnp.result_type(x1.dtype, x2.dtype)
    compute_dtype = jnp.bfloat16 if x1.dtype == jnp.bfloat16 else jnp.float32
    x1 = x1.astype(compute_dtype)       # matmul operands share one dtype
    x2 = x2.astype(out_dtype)           # DMA path copies raw bytes -> dtypes agree
    x1_isz = jnp.dtype(compute_dtype).itemsize
    w_isz = jnp.dtype(compute_dtype).itemsize
    o_isz = jnp.dtype(out_dtype).itemsize

    wh32 = _interp_matrix(h, h_out)     # (H_out, H) f32
    ww32 = _interp_matrix(w, w_out)     # (W_out, W) f32

    vmem_cap = _vmem_capacity_bytes()
    block_budget = int(0.35 * vmem_cap)                      # ~22 MiB v7x, ~45 MiB v5e/v6e
    vmem_limit = int(min(int(0.75 * vmem_cap), 96 * 1024 * 1024))

    use_dense = (w_out < 128) and (h * w * h_out * w_out * w_isz <= _DENSE_WEIGHT_LIMIT)

    if use_dense:
        # ---------------- lane-dense, composed-weight path (small maps) --------
        hw, l_out = h * w, h_out * w_out
        # kron(Wh, Ww)^T : out_flat = x_flat @ wfull_t
        wfull_t = jnp.einsum('oh,jw->hwoj', wh32, ww32).reshape(hw, l_out)
        wfull_t = wfull_t.astype(compute_dtype)
        x1f = x1.reshape(n, c1, hw)
        x2f = x2.reshape(n, c2, l_out)

        per_block = c1 * hw * x1_isz + c2 * l_out * o_isz + c_tot * l_out * o_isz
        per_temp = (c1 * hw + 2 * c1 * l_out) * 4            # f32 matmul temporaries
        nb = _choose_nb(n, per_block, per_temp, hw * l_out * w_isz, block_budget)
        grid = (n // nb,)

        flops = int(2 * n * c1 * hw * l_out)
        bytes_acc = int(x1f.size * x1_isz + x2f.size * o_isz
                        + wfull_t.size * w_isz + n * c_tot * l_out * o_isz)

        out = pl.pallas_call(
            _dense_kernel,
            out_shape=jax.ShapeDtypeStruct((n, c_tot, l_out), out_dtype),
            grid=grid,
            in_specs=[
                pl.BlockSpec((hw, l_out), lambda i: (0, 0)),           # composed weight
                pl.BlockSpec((nb, c1, hw), lambda i: (i, 0, 0)),       # x1 (flattened)
                pl.BlockSpec((nb, c2, l_out), lambda i: (i, 0, 0)),    # x2 (flattened)
            ],
            out_specs=pl.BlockSpec((nb, c_tot, l_out), lambda i: (i, 0, 0)),
            compiler_params=pltpu.CompilerParams(
                dimension_semantics=("parallel",),
                vmem_limit_bytes=vmem_limit),
            cost_estimate=pl.CostEstimate(
                flops=flops, transcendentals=0, bytes_accessed=bytes_acc),
        )(wfull_t, x1f, x2f)
        return out.reshape(n, c_tot, h_out, w_out)

    # -------------------- separable path (W_out >= 128, x2 via DMA) ------------
    wh = wh32.astype(compute_dtype)           # (H_out, H)
    wwt = ww32.T.astype(compute_dtype)        # (W, W_out), transposed once here

    per_block = c1 * h * w * x1_isz + c_tot * h_out * w_out * o_isz   # x2 not blocked
    per_temp = (c1 * h * w_out * 4                    # a (f32)
                + c1 * h * w_out * w_isz              # a cast to compute dtype
                + c1 * h_out * h * w_isz              # Wh broadcast
                + c1 * h_out * w_out * 4)             # up (f32)
    weight_bytes = (h_out * h + w * w_out) * w_isz
    nb = _choose_nb(n, per_block, per_temp, weight_bytes, block_budget)
    grid = (n // nb,)

    flops = int(2 * n * c1 * h * w_out * (w + h_out))
    bytes_acc = int(x1.size * x1_isz + x2.size * o_isz
                    + (wh.size + wwt.size) * w_isz
                    + n * c_tot * h_out * w_out * o_isz)

    return pl.pallas_call(
        _separable_kernel,
        out_shape=jax.ShapeDtypeStruct((n, c_tot, h_out, w_out), out_dtype),
        grid=grid,
        in_specs=[
            pl.BlockSpec((h_out, h), lambda i: (0, 0)),               # Wh (resident)
            pl.BlockSpec((w, w_out), lambda i: (0, 0)),               # Ww^T (resident)
            pl.BlockSpec((nb, c1, h, w), lambda i: (i, 0, 0, 0)),     # x1 image block
            pl.BlockSpec(memory_space=pl.ANY),                        # x2 stays in HBM
        ],
        out_specs=pl.BlockSpec((nb, c_tot, h_out, w_out), lambda i: (i, 0, 0, 0)),
        scratch_shapes=[pltpu.SemaphoreType.DMA],
        compiler_params=pltpu.CompilerParams(
            dimension_semantics=("parallel",),
            vmem_limit_bytes=vmem_limit),
        cost_estimate=pl.CostEstimate(
            flops=flops, transcendentals=0, bytes_accessed=bytes_acc),
    )(wh, wwt, x1, x2)


# -------------------------------------------------------------------- main ----

if __name__ == "__main__":
    key = jax.random.PRNGKey(0)
    k1, k2, k3, k4 = jax.random.split(key, 4)
    scale = 2

    # --- small-map shapes (spec-sized): lane-dense composed-weight path -------
    x1 = jax.random.normal(k1, (2, 4, 8, 8), dtype=jnp.float32)      # (N, C1, H, W)
    x2 = jax.random.normal(k2, (2, 4, 16, 16), dtype=jnp.float32)    # (N, C2, H*s, W*s)
    out = jax.block_until_ready(decoder_forward(x1, x2, scale))
    assert out.shape == (2, 8, 16, 16), out.shape
    wh_r, ww_r = _interp_matrix(8, 16), _interp_matrix(8, 16)
    ref_up = jnp.einsum("oh,nchw,pw->ncop", wh_r, x1, ww_r)
    assert jnp.allclose(out[:, :4], ref_up, atol=1e-4), "upsample mismatch (dense path)"
    assert jnp.allclose(out[:, 4:], x2), "concat mismatch (dense path)"

    # --- large-map shapes (W_out >= 128): separable path, x2 via async DMA ----
    x1b = jax.random.normal(k3, (2, 3, 16, 64), dtype=jnp.float32)
    x2b = jax.random.normal(k4, (2, 2, 32, 128), dtype=jnp.float32)
    outb = jax.block_until_ready(decoder_forward(x1b, x2b, scale))
    assert outb.shape == (2, 5, 32, 128), outb.shape
    wh_r, ww_r = _interp_matrix(16, 32), _interp_matrix(64, 128)
    ref_upb = jnp.einsum("oh,nchw,pw->ncop", wh_r, x1b, ww_r)
    assert jnp.allclose(outb[:, :3], ref_upb, atol=1e-4), "upsample mismatch (separable path)"
    assert jnp.allclose(outb[:, 3:], x2b), "concat mismatch (separable path)"

    print("KERNEL_OK")
</pallas_src>

<mosaic_0001>
module attributes {stable_mosaic.version = 11 : i64} {
  func.func @_dense_kernel(%arg0: i32, %arg1: memref<64x256xf32, #tpu.memory_space<vmem>>, %arg2: memref<2x4x64xf32, #tpu.memory_space<vmem>>, %arg3: memref<2x4x256xf32, #tpu.memory_space<vmem>>, %arg4: memref<2x8x256xf32, #tpu.memory_space<vmem>>) attributes {dimension_semantics = [#tpu.dimension_semantics<parallel>], iteration_bounds = array<i64: 1>, scalar_prefetch = 0 : i64, scratch_operands = 0 : i64, tpu.core_type = #tpu.core_type<tc>, window_params = [{pipeline_mode = #tpu.pipeline_mode<synchronous>, transform_indices = @transform_0, window_bounds = array<i64: 64, 256>}, {transform_indices = @transform_1, window_bounds = array<i64: 2, 4, 64>}, {transform_indices = @transform_2, window_bounds = array<i64: 2, 4, 256>}, {transform_indices = @transform_3, window_bounds = array<i64: 2, 8, 256>}]} {
    %c0 = arith.constant 0 : index
    %c0_0 = arith.constant 0 : index
    %0 = vector.load %arg1[%c0, %c0_0] : memref<64x256xf32, #tpu.memory_space<vmem>>, vector<64x256xf32>
    %c0_1 = arith.constant 0 : index
    %c0_2 = arith.constant 0 : index
    %c0_3 = arith.constant 0 : index
    %1 = vector.load %arg3[%c0_1, %c0_2, %c0_3] : memref<2x4x256xf32, #tpu.memory_space<vmem>>, vector<2x4x256xf32>
    %c0_4 = arith.constant 0 : index
    %c4 = arith.constant 4 : index
    %c0_5 = arith.constant 0 : index
    %2 = vector.load %arg4[%c0_4, %c4, %c0_5] : memref<2x8x256xf32, #tpu.memory_space<vmem>>, vector<2x4x256xf32>
    tpu.vector_store %arg4[%c0_4, %c4, %c0_5], %1 {strides = array<i32>} : memref<2x8x256xf32, #tpu.memory_space<vmem>>, vector<2x4x256xf32>,
    %c0_i32 = arith.constant 0 : i32
    %c2_i32 = arith.constant 2 : i32
    %3 = arith.addi %c0_i32, %c2_i32 : i32
    %c1_i32 = arith.constant 1 : i32
    scf.for %arg5 = %c0_i32 to %3 step %c1_i32  : i32 {
      %4 = arith.index_cast %arg5 : i32 to index
      %c0_7 = arith.constant 0 : index
      %c0_8 = arith.constant 0 : index
      %5 = vector.load %arg2[%4, %c0_7, %c0_8] : memref<2x4x64xf32, #tpu.memory_space<vmem>>, vector<1x4x64xf32>
      %6 = vector.shape_cast %5 : vector<1x4x64xf32> to vector<4x64xf32>
      %cst = arith.constant dense<0.000000e+00> : vector<4x256xf32>
      %7 = tpu.matmul %6, %0, %cst {dimension_numbers = #tpu.dot_dimension_numbers<[1], [0], [0], [1], [0, 0, 1, 1], [], []>} : vector<4x64xf32>, vector<64x256xf32>, vector<4x256xf32> -> vector<4x256xf32>
      %8 = vector.shape_cast %7 : vector<4x256xf32> to vector<1x4x256xf32>
      %9 = arith.index_cast %arg5 : i32 to index
      %c0_9 = arith.constant 0 : index
      %c0_10 = arith.constant 0 : index
      %10 = vector.load %arg4[%9, %c0_9, %c0_10] : memref<2x8x256xf32, #tpu.memory_space<vmem>>, vector<1x4x256xf32>
      tpu.vector_store %arg4[%9, %c0_9, %c0_10], %8 {strides = array<i32>} : memref<2x8x256xf32, #tpu.memory_space<vmem>>, vector<1x4x256xf32>,
    }
    %c2_i32_6 = arith.constant 2 : i32
    return
  }
  func.func @transform_0(%arg0: i32) -> (i32, i32) {
    %c0_i32 = arith.constant 0 : i32
    %c0_i32_0 = arith.constant 0 : i32
    %c0_i32_1 = arith.constant 0 : i32
    return %c0_i32, %c0_i32_0 : i32, i32
  }
  func.func @transform_1(%arg0: i32) -> (i32, i32, i32) {
    %c0_i32 = arith.constant 0 : i32
    %c0_i32_0 = arith.constant 0 : i32
    %c0_i32_1 = arith.constant 0 : i32
    return %arg0, %c0_i32, %c0_i32_0 : i32, i32, i32
  }
  func.func @transform_2(%arg0: i32) -> (i32, i32, i32) {
    %c0_i32 = arith.constant 0 : i32
    %c0_i32_0 = arith.constant 0 : i32
    %c0_i32_1 = arith.constant 0 : i32
    return %arg0, %c0_i32, %c0_i32_0 : i32, i32, i32
  }
  func.func @transform_3(%arg0: i32) -> (i32, i32, i32) {
    %c0_i32 = arith.constant 0 : i32
    %c0_i32_0 = arith.constant 0 : i32
    %c0_i32_1 = arith.constant 0 : i32
    return %arg0, %c0_i32, %c0_i32_0 : i32, i32, i32
  }
}

</mosaic_0001>

<bundles_post_ra>
// kernel: tpu_custom_call.1
= control target key start
LH: loop header
LB: loop body
LE: loop exit
PB: predicated region body
PF: predicated region fallthrough
CT: control target
= control target key end

     0   :  { %8 = vsyncpa [#allocation3], 0  ;;  %s439_s0 = inlined_call_operand.hbm [shape: f32[64,256], index: 0, kind: input, shape index: {}]   ;;  %s440_s1 = inlined_call_operand.hbm [shape: f32[2,4,64], index: 1, kind: input, shape index: {}]   ;;  %s441_s2 = inlined_call_operand.hbm [shape: f32[2,4,256], index: 2, kind: input, shape index: {}]   ;;  %s442_s3 = inlined_call_operand.hbm [shape: f32[2,8,256], index: 3, kind: output, shape index: {}]  }
   0x1   :  { %9 = vsyncpa [#allocation6], 0 }
   0x2   :  { %10 = vsyncpa [#allocation4], 0  ;;  %s344_s12 = smov [#allocation5]   ;;  %s242_s16 = scalar_lea.hbm %s440_s1, 128 }
   0x3   :  { %s28_s13 = sshll.u32 %s344_s12, 4  ;;  %p243_p0 = scmp.ne.s32.totalorder %s440_s1, %s242_s16  ;;  %s29_s13 = int_to_ptr.vmem [resolvable:$true] %s28_s13 }
   0x4   :  { %p246_p1 = scmp.lt.u32.totalorder %s242_s16, %s440_s1 }
   0x6   :  { %p248_p2 = pnand %p246_p1, %p243_p0 }
   0x8   :  { %251 = shalt.err (!%p248_p2)
}
   0x9   :  { %s252_s21 = scalar_lea.vmem %s29_s13, 128  ;;  %p257_p4 = scmp.lt.s32.totalorder %s29_s13, %s29_s13 }
   0xa   :  { %p253_p3 = scmp.ne.s32.totalorder %s29_s13, %s252_s21  ;;  %p258_p5 = scmp.lt.s32.totalorder %s252_s21, %s252_s21 }
   0xc   :  { %p259_p6 = por %p258_p5, %p257_p4 }
   0xe   :  { %p260_p7 = pnand %p259_p6, %p253_p3 }
  0x10   :  { %263 = shalt.err (!%p260_p7)
}
  0x11   :  { %s345_s22 = smov 64   ;;  %s346_s23 = smov 4  }
  0x12   :  { %34 = dma.hbm_to_vmem [thread:$0]  %s440_s1, 128, %s29_s13, [#allocation6], %s345_s22, %s345_s22, %s346_s23  }
  0x13   :  { %s347_s26 = smov [#allocation2]   ;;  %s264_s30 = scalar_lea.hbm %s439_s0, 2048 }
  0x14   :  { %s16_s27 = sshll.u32 %s347_s26, 4  ;;  %p265_p8 = scmp.ne.s32.totalorder %s439_s0, %s264_s30  ;;  %s17_s27 = int_to_ptr.vmem [resolvable:$true] %s16_s27 }
  0x15   :  { %p268_p9 = scmp.lt.u32.totalorder %s264_s30, %s439_s0 }
  0x17   :  { %p270_p10 = pnand %p268_p9, %p265_p8 }
  0x19   :  { %273 = shalt.err (!%p270_p10)
}
  0x1a   :  { %s274_s8 = scalar_lea.vmem %s17_s27, 2048  ;;  %p279_p12 = scmp.lt.s32.totalorder %s17_s27, %s17_s27 }
  0x1b   :  { %p275_p11 = scmp.ne.s32.totalorder %s17_s27, %s274_s8  ;;  %p280_p13 = scmp.lt.s32.totalorder %s274_s8, %s274_s8 }
  0x1d   :  { %p281_p0 = por %p280_p13, %p279_p12 }
  0x1f   :  { %p282_p1 = pnand %p281_p0, %p275_p11 }
  0x21   :  { %285 = shalt.err (!%p282_p1)
}
  0x22   :  { %s348_s1 = smov 256   ;;  %s349_s9 = smov 16  }
  0x23   :  { %22 = dma.hbm_to_vmem [thread:$0]  %s439_s0, 2048, %s17_s27, [#allocation3], %s348_s1, %s348_s1, %s349_s9  }
  0x24   :  { %s350_s12 = smov [#allocation7]   ;;  %s286_s16 = scalar_lea.hbm %s441_s2, 256 }
  0x25   :  { %s40_s13 = sshll.u32 %s350_s12, 4  ;;  %p287_p2 = scmp.ne.s32.totalorder %s441_s2, %s286_s16  ;;  %s41_s13 = int_to_ptr.vmem [resolvable:$true] %s40_s13 }
  0x26   :  { %p290_p3 = scmp.lt.u32.totalorder %s286_s16, %s441_s2 }
  0x28   :  { %p292_p4 = pnand %p290_p3, %p287_p2 }
  0x2a   :  { %295 = shalt.err (!%p292_p4)
}
  0x2b   :  { %s296_s21 = scalar_lea.vmem %s41_s13, 256  ;;  %p301_p6 = scmp.lt.s32.totalorder %s41_s13, %s41_s13 }
  0x2c   :  { %p297_p5 = scmp.ne.s32.totalorder %s41_s13, %s296_s21  ;;  %p302_p7 = scmp.lt.s32.totalorder %s296_s21, %s296_s21 }
  0x2e   :  { %p303_p8 = por %p302_p7, %p301_p6 }
  0x30   :  { %p304_p9 = pnand %p303_p8, %p297_p5 }
  0x32   :  { %307 = shalt.err (!%p304_p9)
}
  0x33   :  { %s351_s0 = smov 128   ;;  %s352_s22 = smov 8  }
  0x34   :  { %46 = dma.hbm_to_vmem [thread:$0]  %s441_s2, 256, %s41_s13, [#allocation6], %s351_s0, %s351_s0, %s352_s22  }
  0x35   :  { %334 = dma.done.wait [#allocation3], 2048  }
  0x36   :  { %335 = vsyncadd [#allocation3], 4294965248 }
  0x37   :  { %336 = dma.done.wait [#allocation6], 384  }
  0x38   :  { %337 = vsyncadd [#allocation6], 4294966912  ;;  %v56_v0 = vld [vmem:[#allocation2] sm:$0xff]  ;;  %v57_v1 = vld [vmem:[#allocation2 + $0x8] sm:$0xff]  ;;  %s414_s2 = smov 0  }
  0x39   :  { %v58_v2 = vld [vmem:[#allocation2 + $0x10] sm:$0xff]  ;;  %v59_v3 = vld [vmem:[#allocation2 + $0x18] sm:$0xff]  ;;  %v60_v4 = vld [vmem:[#allocation2 + $0x20] sm:$0xff] }
  0x3a   :  { %v61_v5 = vld [vmem:[#allocation2 + $0x28] sm:$0xff]  ;;  %v62_v6 = vld [vmem:[#allocation2 + $0x30] sm:$0xff]  ;;  %v63_v7 = vld [vmem:[#allocation2 + $0x38] sm:$0xff] }
  0x3b   :  { %v64_v8 = vld [vmem:[#allocation2 + $0x40] sm:$0xff]  ;;  %v65_v9 = vld [vmem:[#allocation2 + $0x48] sm:$0xff]  ;;  %v66_v10 = vld [vmem:[#allocation2 + $0x50] sm:$0xff] }
  0x3c   :  { %v67_v11 = vld [vmem:[#allocation2 + $0x58] sm:$0xff]  ;;  %v68_v12 = vld [vmem:[#allocation2 + $0x60] sm:$0xff]  ;;  %v69_v13 = vld [vmem:[#allocation2 + $0x68] sm:$0xff] }
  0x3d   :  { %v70_v14 = vld [vmem:[#allocation2 + $0x70] sm:$0xff]  ;;  %v71_v15 = vld [vmem:[#allocation2 + $0x78] sm:$0xff]  ;;  %v72_v16 = vld [vmem:[#allocation7] sm:$0xff] }
  0x3e   :  { %v73_v17 = vld [vmem:[#allocation7 + $0x8] sm:$0xff]  ;;  %v76_v18 = vcombine.low %v72_v16, %v72_v16  ;;  %81 = vst [vmem:[#allocation8 + $0x8] sm:$0xf0] %v72_v16 }
  0x3f   :  { %v77_v19 = vcombine.low %v73_v17, %v73_v17  ;;  %83 = vst [vmem:[#allocation8 + $0x18] sm:$0xf0] %v73_v17 }
  0x40   :  { %80 = vst [vmem:[#allocation8] sm:$0xf0] %v76_v18 }
  0x41   :  { %82 = vst [vmem:[#allocation8 + $0x10] sm:$0xf0] %v77_v19 }
  0x42 LB: > { %v205_v20 = vpack.c.bf16 %v59_v3, %v57_v1  ;;  %v207_v21 = vpack.c.bf16 %v58_v2, %v56_v0  ;;  %v209_v22 = vpack.c.bf16 %v63_v7, %v61_v5  ;;  %v211_v23 = vpack.c.bf16 %v62_v6, %v60_v4  ;;  %s200_s25 = sshll.u32 %s342_s2, 2  ;;  %s204_s27 = sshll.u32 %s342_s2, 4  ;;  %s342_s2 = sphi %s414_s2, %s89_s2  }
  0x43   : > { %v353_v24 = vmov 0.0   ;;  %v213_v25 = vpack.c.bf16 %v67_v11, %v65_v9  ;;  %v215_v26 = vpack.c.bf16 %v66_v10, %v64_v8  ;;  %v217_v27 = vpack.c.bf16 %v71_v15, %v69_v13  ;;  %s91_s26 = scalar_lea.vmem [#allocation5], %s200_s25  ;;  %s170_s28 = scalar_lea.vmem [#allocation8], %s204_s27 }
  0x44   : > { %206 = vmatprep.subr.bf16.mxu0 %v205_v20  ;;  %161 = vmatprep.mubr.f32.mxu0 %v353_v24  ;;  %v219_v28 = vpack.c.bf16 %v70_v14, %v68_v12  ;;  %v92_v29 = vld [vmem:[%s91_s26] sm:$0xf]  ;;  %vm93_vm0 = vcmask 523264   ;;  %s89_s2 = sadd.s32 1, %s342_s2  }
  0x45   : > { %208 = vmatpush1.bf16.msra.mxu0 %v207_v21  ;;  %p86_p10 = scmp.ge.s32.totalorder %s89_s2, 2  }
  0x46   : > { %210 = vmatprep.subr.bf16.mxu0 %v209_v22  ;;  %s354_s29 = smov (%p86_p10), [#allocation8]  }
  0x47   :  { %s178_s30 = sshll.u32 (%p86_p10), %s354_s29, 4  ;;  %s179_s30 = int_to_ptr.vmem [resolvable:$true] %s178_s30 }
  0x48   :  { %s308_s4 = scalar_lea.vmem (%p86_p10), %s179_s30, 512  ;;  %p313_p12 = scmp.lt.s32.totalorder (%p86_p10), %s179_s30, %s179_s30 }
  0x49   : > { %212 = vmatpush1.bf16.msra.mxu0 %v211_v23  ;;  %p309_p11 = scmp.ne.s32.totalorder (%p86_p10), %s179_s30, %s308_s4  ;;  %p314_p13 = scmp.lt.s32.totalorder (%p86_p10), %s308_s4, %s308_s4 }
  0x4a   : > { %214 = vmatprep.subr.bf16.mxu0 %v213_v25 }
  0x4b   :  { %p315_p0 = por (%p86_p10), %p314_p13, %p313_p12 }
  0x4d   : > { %216 = vmatpush1.bf16.msra.mxu0 %v215_v26  ;;  %p316_p1 = pnand (%p86_p10), %p315_p0, %p309_p11 }
  0x4e   : > { %218 = vmatprep.subr.bf16.mxu0 %v217_v27 }
  0x51   : > { %220 = vmatpush1.bf16.msra.mxu0 %v219_v28 }
  0x54   : > { %201 = vmatmul.mubr.msk.f32.vlgmr.msra.gmra.mrb[0].mxu0 %vm93_vm0, %v92_v29 }
 0x123   :  { %88 = sbr.rel (!%p86_p10) target bundleno = 66 (0x42), region = 53 }
 0x127   : > { %v163_v30 = vpop.f32.mrb[0].mxu0 }
 0x128   : > { %171 = vst [vmem:[%s170_s28] sm:$0xf] %v163_v30  ;;  %v165_v31 = vpop.f32.mrb[1].mxu0 }
 0x129   : > { %172 = vst [vmem:[%s170_s28 + $0x8] sm:$0xf] %v165_v31 }
 0x12a   :  { %319 = shalt.err (!%p316_p1)
}
 0x12b   :  { %s320_s7 = scalar_lea.hbm %s442_s3, 512 }
 0x12c   :  { %p321_p2 = scmp.ne.s32.totalorder %s442_s3, %s320_s7  ;;  %p324_p3 = scmp.lt.u32.totalorder %s320_s7, %s442_s3 }
 0x12e   :  { %p326_p4 = pnand %p324_p3, %p321_p2 }
 0x130   :  { %329 = shalt.err (!%p326_p4)
}
 0x131   :  { %184 = dma.vmem_to_hbm [thread:$0]  %s179_s30, 512, %s442_s3, [#allocation4], %s348_s1, %s348_s1, %s349_s9  }
 0x132   :  { %338 = dma.done.wait [#allocation4], 512  }
 0x133   :  { %339 = vsyncadd [#allocation4], 4294966784 }
 0x134   :  { %188 = vsyncpa [#allocation3], 1 }
 0x135   :  { %189 = vsyncpa [#allocation6], 1 }
 0x136   :  { %190 = vsyncpa [#allocation4], 1 }

</bundles_post_ra>
